<compile_context>
chip_gen: v7x
topology: tpu7x:2x2x1
jax: 0.10.0
libtpu: 0.0.40
codegen_flags: <defaults>
</compile_context>

<pallas_src>
import functools

import jax
import jax.numpy as jnp
from jax.experimental import pallas as pl
from jax.experimental.pallas import tpu as pltpu

_ALIGN = 32  # sublane alignment that also covers bf16 (16,128) / int8 (32,128) tiling


def _round_up(a: int, b: int) -> int:
    return ((a + b - 1) // b) * b


def _tpu_params():
    """(physical VMEM bytes, #TensorCores) with safe fallbacks."""
    vmem_cap = 128 * 1024 * 1024
    num_cores = 1
    try:
        info = pltpu.get_tpu_info()
        vmem_cap = int(getattr(info, "vmem_capacity_bytes", vmem_cap) or vmem_cap)
        num_cores = int(
            getattr(info, "num_cores", None)
            or getattr(info, "core_count", None)
            # v7x is the 64-MiB-VMEM, 2-TC part; older parts are 128 MiB, 1 TC.
            or (2 if vmem_cap <= 64 * 1024 * 1024 else 1)
        )
    except Exception:  # not on TPU / API drift -> conservative defaults
        pass
    return vmem_cap, num_cores


def _deletion_kernel(x_ref, m_ref, wd_ref, s_ref, o_ref):
    # x_ref:  (tile_g, D)   packed node features (D = fold * dim, lane-dense)
    # m_ref:  (tile_g, FK)  per-original-row mask as int8 0/1 (FK >= fold, padded)
    # wd_ref: (D, D)        blockdiag(W, ..., W)            (grid-invariant)
    # s_ref:  (FK, D)       mask -> lane selection matrix   (grid-invariant)
    # o_ref:  (tile_g, D)
    x = x_ref[...]
    # MXU: packed matmul against the block-diagonal deletion weight
    # (default precision on purpose; HIGHEST would bind the MXU on v5e).
    y = jnp.dot(x, wd_ref[...], preferred_element_type=jnp.float32)
    # MXU (tiny K=FK): expand the row mask to a (tile_g, D) lane mask; values
    # are exactly 0.0/1.0 since both operands are exact 0/1.
    m = jnp.dot(m_ref[...].astype(jnp.float32), s_ref[...],
                preferred_element_type=jnp.float32)
    o_ref[...] = jnp.where(m > 0.5, y.astype(x.dtype), x)


@functools.partial(jax.jit, static_argnames=("tile_rows",))
def deletion_layer(x, mask, deletion_weight, *, tile_rows=None):
    """out[i] = x[i] @ W if mask[i] else x[i].

    x: (N, dim) float32; mask: (N,) bool/int; deletion_weight: (dim, dim).
    """
    N, dim = x.shape
    dtype = x.dtype
    esz = jnp.dtype(dtype).itemsize

    # Fold consecutive rows into 128-lane rows when possible (lane-dense I/O).
    fold = 128 // dim if (dim <= 128 and 128 % dim == 0) else 1
    D = fold * dim
    FK = max(fold, 8)                      # mask block width (sublane aligned)
    D_l = _round_up(D, 128)                # lane-padded widths for VMEM accounting
    FK_l = _round_up(FK, 128)

    vmem_cap, num_cores = _tpu_params()

    # ---- tile sizing --------------------------------------------------------
    if tile_rows is None:
        # x-block bytes per grid step: bigger on the high-BW / small-VMEM part.
        target = 8 * 2**20 if vmem_cap <= 64 * 2**20 else 4 * 2**20
        tile_rows = max(_ALIGN * fold, (target // (D_l * esz)) * fold)

    G = -(-N // fold)                       # packed rows needed
    G_al = _round_up(G, _ALIGN)

    tile_g = max(_ALIGN, (tile_rows // fold) // _ALIGN * _ALIGN)

    # Cap by double-buffered VMEM footprint: x + out (dtype) + int8 mask,
    # all lane-padded, plus the (double-buffered) grid-invariant weights.
    fixed = 2 * (D * D_l * esz + FK * D_l * 4)
    per_row = 2 * (2 * D_l * esz + FK_l)
    max_tile_g = max(_ALIGN,
                     int((vmem_cap * 7 // 10 - fixed) // per_row) // _ALIGN * _ALIGN)
    tile_g = min(tile_g, max_tile_g, G_al)

    # Only force >=2 grid steps where it buys TensorCore parallelism (v7x).
    if num_cores >= 2 and G_al >= 2 * _ALIGN and tile_g >= G_al:
        tile_g = _round_up(-(-G_al // 2), _ALIGN)

    G_pad = _round_up(G_al, tile_g)
    N_pad = G_pad * fold

    vmem_needed = fixed + per_row * tile_g
    vmem_limit = int(min(max(vmem_needed * 5 // 4, 32 * 2**20), vmem_cap * 3 // 4))
    vmem_limit = max(vmem_limit, vmem_needed + (1 << 20))

    # ---- pack inputs (padded rows get mask=0 -> passthrough; sliced off) ----
    pad_rows = N_pad - N
    x_p = jnp.pad(x, ((0, pad_rows), (0, 0))) if pad_rows else x
    x_packed = x_p.reshape(G_pad, D)

    m_i8 = mask.astype(jnp.int8).reshape(-1)
    if pad_rows:
        m_i8 = jnp.pad(m_i8, (0, pad_rows))
    m_packed = m_i8.reshape(G_pad, fold)
    if FK != fold:
        m_packed = jnp.pad(m_packed, ((0, 0), (0, FK - fold)))

    # blockdiag(W, ..., W) and the mask->lane selection matrix (built once).
    w = deletion_weight.astype(dtype)
    wd = jnp.kron(jnp.eye(fold, dtype=dtype), w) if fold > 1 else w
    sel = jnp.kron(jnp.eye(fold, dtype=jnp.float32),
                   jnp.ones((1, dim), jnp.float32))       # (fold, D)
    if FK != fold:
        sel = jnp.pad(sel, ((0, FK - fold), (0, 0)))       # (FK, D)

    cost = pl.CostEstimate(
        flops=2 * G_pad * D * D + 2 * G_pad * FK * D,
        transcendentals=0,
        bytes_accessed=2 * G_pad * D * esz + G_pad * FK + (D * D * esz + FK * D * 4),
    )

    grid = (G_pad // tile_g,)
    out_packed = pl.pallas_call(
        _deletion_kernel,
        out_shape=jax.ShapeDtypeStruct((G_pad, D), dtype),
        grid_spec=pltpu.PrefetchScalarGridSpec(
            num_scalar_prefetch=0,
            grid=grid,
            in_specs=[
                pl.BlockSpec((tile_g, D), lambda i: (i, 0)),   # packed x tile
                pl.BlockSpec((tile_g, FK), lambda i: (i, 0)),  # int8 row-mask tile
                pl.BlockSpec((D, D), lambda i: (0, 0)),        # blockdiag weight
                pl.BlockSpec((FK, D), lambda i: (0, 0)),       # selection matrix
            ],
            out_specs=pl.BlockSpec((tile_g, D), lambda i: (i, 0)),
        ),
        compiler_params=pltpu.CompilerParams(
            dimension_semantics=("parallel",),
            vmem_limit_bytes=vmem_limit,
        ),
        input_output_aliases={0: 0},   # donate packed x temp as output buffer
        cost_estimate=cost,
    )(x_packed, m_packed, wd, sel)

    out = out_packed.reshape(N_pad, dim)
    return out[:N] if pad_rows else out


if __name__ == "__main__":
    key = jax.random.PRNGKey(0)
    kx, km = jax.random.split(key)

    N, dim = 128, 32  # small synthetic graph: 128 nodes, hidden dim 32
    x = jax.random.normal(kx, (N, dim), dtype=jnp.float32)
    mask = jax.random.bernoulli(km, p=0.5, shape=(N,))  # local-node mask

    # deterministic parameter init (matches nn.Parameter(torch.ones(dim, dim) / 1000))
    deletion_weight = jnp.ones((dim, dim), dtype=jnp.float32) / 1000.0

    out = deletion_layer(x, mask, deletion_weight)
    out = jax.block_until_ready(out)

    # reference check (plain JAX)
    ref = jnp.where(mask[:, None], x @ deletion_weight, x)
    assert out.shape == (N, dim)
    assert jnp.allclose(out, ref, atol=1e-5, rtol=1e-5)

    print("KERNEL_OK")
</pallas_src>

<mosaic_0001>
module attributes {stable_mosaic.version = 11 : i64} {
  func.func @_deletion_kernel(%arg0: i32, %arg1: memref<32x128xf32, #tpu.memory_space<vmem>>, %arg2: memref<32x8xi8, #tpu.memory_space<vmem>>, %arg3: memref<128x128xf32, #tpu.memory_space<vmem>>, %arg4: memref<8x128xf32, #tpu.memory_space<vmem>>, %arg5: memref<32x128xf32, #tpu.memory_space<vmem>>) attributes {dimension_semantics = [#tpu.dimension_semantics<parallel>], iteration_bounds = array<i64: 1>, scalar_prefetch = 0 : i64, scratch_operands = 0 : i64, tpu.core_type = #tpu.core_type<tc>, window_params = [{transform_indices = @transform_0, window_bounds = array<i64: 32, 128>}, {transform_indices = @transform_1, window_bounds = array<i64: 32, 8>}, {pipeline_mode = #tpu.pipeline_mode<synchronous>, transform_indices = @transform_2, window_bounds = array<i64: 128, 128>}, {pipeline_mode = #tpu.pipeline_mode<synchronous>, transform_indices = @transform_3, window_bounds = array<i64: 8, 128>}, {transform_indices = @transform_4, window_bounds = array<i64: 32, 128>}]} {
    %c0 = arith.constant 0 : index
    %c0_0 = arith.constant 0 : index
    %0 = vector.load %arg1[%c0, %c0_0] : memref<32x128xf32, #tpu.memory_space<vmem>>, vector<32x128xf32>
    %c0_1 = arith.constant 0 : index
    %c0_2 = arith.constant 0 : index
    %1 = vector.load %arg3[%c0_1, %c0_2] : memref<128x128xf32, #tpu.memory_space<vmem>>, vector<128x128xf32>
    %cst = arith.constant dense<0.000000e+00> : vector<32x128xf32>
    %2 = tpu.matmul %0, %1, %cst {dimension_numbers = #tpu.dot_dimension_numbers<[1], [0], [0], [1], [0, 0, 1, 1], [], []>} : vector<32x128xf32>, vector<128x128xf32>, vector<32x128xf32> -> vector<32x128xf32>
    %c0_3 = arith.constant 0 : index
    %c0_4 = arith.constant 0 : index
    %3 = vector.load %arg2[%c0_3, %c0_4] : memref<32x8xi8, #tpu.memory_space<vmem>>, vector<32x8xi8>
    %4 = arith.sitofp %3 : vector<32x8xi8> to vector<32x8xf32>
    %c0_5 = arith.constant 0 : index
    %c0_6 = arith.constant 0 : index
    %5 = vector.load %arg4[%c0_5, %c0_6] : memref<8x128xf32, #tpu.memory_space<vmem>>, vector<8x128xf32>
    %cst_7 = arith.constant dense<0.000000e+00> : vector<32x128xf32>
    %6 = tpu.matmul %4, %5, %cst_7 {dimension_numbers = #tpu.dot_dimension_numbers<[1], [0], [0], [1], [0, 0, 1, 1], [], []>} : vector<32x8xf32>, vector<8x128xf32>, vector<32x128xf32> -> vector<32x128xf32>
    %cst_8 = arith.constant 5.000000e-01 : f32
    %7 = vector.broadcast %cst_8 : f32 to vector<32x128xf32>
    %8 = arith.cmpf ogt, %6, %7 : vector<32x128xf32>
    %9 = arith.select %8, %2, %0 : vector<32x128xi1>, vector<32x128xf32>
    %c0_9 = arith.constant 0 : index
    %c0_10 = arith.constant 0 : index
    %10 = vector.load %arg5[%c0_9, %c0_10] : memref<32x128xf32, #tpu.memory_space<vmem>>, vector<32x128xf32>
    tpu.vector_store %arg5[%c0_9, %c0_10], %9 {strides = array<i32>} : memref<32x128xf32, #tpu.memory_space<vmem>>, vector<32x128xf32>,
    return
  }
  func.func @transform_0(%arg0: i32) -> (i32, i32) {
    %c0_i32 = arith.constant 0 : i32
    %c0_i32_0 = arith.constant 0 : i32
    return %arg0, %c0_i32 : i32, i32
  }
  func.func @transform_1(%arg0: i32) -> (i32, i32) {
    %c0_i32 = arith.constant 0 : i32
    %c0_i32_0 = arith.constant 0 : i32
    return %arg0, %c0_i32 : i32, i32
  }
  func.func @transform_2(%arg0: i32) -> (i32, i32) {
    %c0_i32 = arith.constant 0 : i32
    %c0_i32_0 = arith.constant 0 : i32
    %c0_i32_1 = arith.constant 0 : i32
    return %c0_i32, %c0_i32_0 : i32, i32
  }
  func.func @transform_3(%arg0: i32) -> (i32, i32) {
    %c0_i32 = arith.constant 0 : i32
    %c0_i32_0 = arith.constant 0 : i32
    %c0_i32_1 = arith.constant 0 : i32
    return %c0_i32, %c0_i32_0 : i32, i32
  }
  func.func @transform_4(%arg0: i32) -> (i32, i32) {
    %c0_i32 = arith.constant 0 : i32
    %c0_i32_0 = arith.constant 0 : i32
    return %arg0, %c0_i32 : i32, i32
  }
}

</mosaic_0001>

<bundles_post_ra>
// kernel: deletion_layer.1
= control target key start
LH: loop header
LB: loop body
LE: loop exit
PB: predicated region body
PF: predicated region fallthrough
CT: control target
= control target key end

     0   :  { %vm132_vm0 = vcmask 64512   ;;  %s460_s2 = inlined_call_operand.vmem [shape: f32[128,128], index: 2, kind: input, shape index: {}]   ;;  %s461_s3 = inlined_call_operand.vmem [shape: f32[8,128], index: 3, kind: input, shape index: {}]   ;;  %s462_s1 = inlined_call_operand.vmem [shape: s8[32,8], index: 1, kind: input, shape index: {}]   ;;  %s463_s0 = inlined_call_operand.vmem [shape: f32[32,128], index: 0, kind: input, shape index: {}, may-alias: {0,4}]   ;;  %s464_s4 = inlined_call_operand.vmem [shape: f32[32,128], index: 4, kind: output, shape index: {}, may-alias: {0,4}]  }
   0x1   :  { %v21_v0 = vld [vmem:[%s460_s2] sm:$0xff]  ;;  %v22_v1 = vld [vmem:[%s460_s2 + $0x8] sm:$0xff]  ;;  %v23_v2 = vld [vmem:[%s460_s2 + $0x10] sm:$0xff] }
   0x2   :  { %v321_v3 = vpack.c.bf16 %v22_v1, %v21_v0  ;;  %v24_v4 = vld [vmem:[%s460_s2 + $0x18] sm:$0xff]  ;;  %v25_v6 = vld [vmem:[%s460_s2 + $0x20] sm:$0xff]  ;;  %v26_v7 = vld [vmem:[%s460_s2 + $0x28] sm:$0xff] }
   0x3   :  { %v325_v5 = vpack.c.bf16 %v24_v4, %v23_v2  ;;  %v329_v8 = vpack.c.bf16 %v26_v7, %v25_v6  ;;  %v131_v9 = vld [vmem:[%s461_s3] sm:$0xff]  ;;  %v27_v11 = vld [vmem:[%s460_s2 + $0x30] sm:$0xff]  ;;  %v28_v12 = vld [vmem:[%s460_s2 + $0x38] sm:$0xff] }
   0x4   :  { %322 = vmatprep.subr.bf16.mxu0 %v321_v3  ;;  %v122_v10 = vld [vmem:[%s462_s1] sm:$0xff]  ;;  %313 = vmatprep.subr.mxu1 %v131_v9  ;;  %v333_v21 = vpack.c.bf16 %v28_v12, %v27_v11  ;;  %v30_v23 = vld [vmem:[%s460_s2 + $0x48] sm:$0xff]  ;;  %v31_v26 = vld [vmem:[%s460_s2 + $0x50] sm:$0xff] }
   0x5   :  { %324 = vmatpush3.bf16.msra.mxu0 %v321_v3  ;;  %v123_v13 = vunpack.c.0.s8 %v122_v10  ;;  %v124_v14 = vunpack.c.1.s8 %v122_v10  ;;  %v17_v15 = vld [vmem:[%s463_s0] sm:$0xff]  ;;  %v125_v16 = vunpack.c.2.s8 %v122_v10  ;;  %314 = vmatpush3.msra.mxu1 %v131_v9  ;;  %v126_v17 = vunpack.c.3.s8 %v122_v10  ;;  %v32_v27 = vld [vmem:[%s460_s2 + $0x58] sm:$0xff]  ;;  %v34_v30 = vld [vmem:[%s460_s2 + $0x68] sm:$0xff] }
   0x6   :  { %326 = vmatprep.subr.bf16.mxu0 %v325_v5  ;;  %307 = vmatprep.mubr.f32.mxu0 %v17_v15  ;;  %v29_v22 = vld [vmem:[%s460_s2 + $0x40] sm:$0xff]  ;;  %v341_v28 = vpack.c.bf16 %v32_v27, %v31_v26  ;;  %v35_v32 = vld [vmem:[%s460_s2 + $0x70] sm:$0xff]  ;;  %v36_v33 = vld [vmem:[%s460_s2 + $0x78] sm:$0xff] }
   0x7   :  { %v127_v18 = vcvt.s32.f32 %v123_v13  ;;  %v128_v19 = vcvt.s32.f32 %v124_v14  ;;  %v129_v20 = vcvt.s32.f32 %v125_v16  ;;  %v130_v24 = vcvt.s32.f32 %v126_v17  ;;  %v33_v29 = vld [vmem:[%s460_s2 + $0x60] sm:$0xff]  ;;  %v18_v35 = vld [vmem:[%s463_s0 + $0x8] sm:$0xff]  ;;  %v19_v36 = vld [vmem:[%s463_s0 + $0x10] sm:$0xff] }
   0x8   :  { %v337_v25 = vpack.c.bf16 %v30_v23, %v29_v22  ;;  %v345_v31 = vpack.c.bf16 %v34_v30, %v33_v29  ;;  %v349_v34 = vpack.c.bf16 %v36_v33, %v35_v32  ;;  %v20_v37 = vld [vmem:[%s463_s0 + $0x18] sm:$0xff] }
   0x9   :  { %328 = vmatpush3.bf16.msra.mxu0 %v325_v5  ;;  %315 = vmatprep.mubr.msk.f32.mxu1 %vm132_vm0, %v127_v18 }
   0xa   :  { %330 = vmatprep.subr.bf16.mxu0 %v329_v8  ;;  %316 = vmatmul.mubr.msk.f32.vlgmr.msra.gmra.mrb[0].mxu1 %vm132_vm0, %v128_v19 }
   0xb   :  { %318 = vmatprep.mubr.msk.f32.mxu1 %vm132_vm0, %v129_v20 }
   0xd   :  { %332 = vmatpush3.bf16.msra.mxu0 %v329_v8 }
   0xe   :  { %334 = vmatprep.subr.bf16.mxu0 %v333_v21  ;;  %319 = vmatmul.mubr.msk.f32.gmra.mrb[2].mxu1 %vm132_vm0, %v130_v24 }
  0x11   :  { %336 = vmatpush3.bf16.msra.mxu0 %v333_v21 }
  0x12   :  { %338 = vmatprep.subr.bf16.mxu0 %v337_v25 }
  0x15   :  { %340 = vmatpush3.bf16.msra.mxu0 %v337_v25 }
  0x16   :  { %342 = vmatprep.subr.bf16.mxu0 %v341_v28 }
  0x19   :  { %344 = vmatpush3.bf16.msra.mxu0 %v341_v28 }
  0x1a   :  { %346 = vmatprep.subr.bf16.mxu0 %v345_v31 }
  0x1d   :  { %348 = vmatpush3.bf16.msra.mxu0 %v345_v31 }
  0x1e   :  { %350 = vmatprep.subr.bf16.mxu0 %v349_v34 }
  0x21   :  { %352 = vmatpush3.bf16.msra.mxu0 %v349_v34 }
  0x24   :  { %308 = vmatmul.mubr.f32.vlgmr.msra.gmra.mrb[0].mxu0 %v18_v35 }
  0x25   :  { %310 = vmatprep.mubr.f32.mxu0 %v19_v36 }
  0x28   :  { %311 = vmatmul.mubr.f32.gmra.mrb[2].mxu0 %v20_v37 }
  0xdd   :  { %v317_v38 = vpop.f32.mrb[0].mxu1 }
  0xde   :  { %v211_v39 = vpop.f32.mrb[1].mxu1  ;;  %vm231_vm1 = vcmp.gt.f32.partialorder %v317_v38, 0.5 }
  0xdf   :  { %vm230_vm2 = vcmp.gt.f32.partialorder %v211_v39, 0.5 }
  0xe1   :  { %v320_v40 = vpop.f32.mrb[2].mxu1 }
  0xe2   :  { %v221_v41 = vpop.f32.mrb[3].mxu1  ;;  %vm233_vm3 = vcmp.gt.f32.partialorder %v320_v40, 0.5 }
  0xe3   :  { %vm232_vm4 = vcmp.gt.f32.partialorder %v221_v41, 0.5 }
  0xf7   :  { %v309_v42 = vpop.f32.mrb[0].mxu0 }
  0xf8   :  { %v235_v43 = vsel %vm231_vm1, %v309_v42, %v18_v35  ;;  %v103_v44 = vpop.f32.mrb[1].mxu0 }
  0xf9   :  { %239 = vst [vmem:[%s464_s4 + $0x8] sm:$0xff] %v235_v43  ;;  %v234_v45 = vsel %vm230_vm2, %v103_v44, %v17_v15 }
  0xfa   :  { %238 = vst [vmem:[%s464_s4] sm:$0xff] %v234_v45 }
  0xfb   :  { %v312_v46 = vpop.f32.mrb[2].mxu0 }
  0xfc   :  { %v237_v47 = vsel %vm233_vm3, %v312_v46, %v20_v37  ;;  %v113_v48 = vpop.f32.mrb[3].mxu0 }
  0xfd   :  { %241 = vst [vmem:[%s464_s4 + $0x18] sm:$0xff] %v237_v47  ;;  %v236_v49 = vsel %vm232_vm4, %v113_v48, %v19_v36 }
  0xfe   :  { %240 = vst [vmem:[%s464_s4 + $0x10] sm:$0xff] %v236_v49 }

</bundles_post_ra>
